<compile_context>
chip_gen: v7x
topology: tpu7x:2x2x1
jax: 0.10.0
libtpu: 0.0.40
codegen_flags: <defaults>
</compile_context>

<pallas_src>
import functools

import jax
import jax.numpy as jnp
from jax.experimental import pallas as pl
from jax.experimental.pallas import tpu as pltpu


def _round_up(x, m):
    return ((x + m - 1) // m) * m


def _default_batch_tile():
    """Per-generation default batch tile (rows per grid step)."""
    try:
        kind = jax.devices()[0].device_kind.lower()
    except Exception:
        return 2048
    if "v7" in kind:
        return 8192   # ~3.2 TB/s HBM: need bigger tiles to hide the fixed per-step cost
    return 2048       # v5e / v6e sweet spot from measured tile sweeps


def _make_chain_kernel(num_weights, compute_dtype):
    """out_tile = x_tile @ W1 @ ... @ Wn with f32 MXU accumulation.

    The x tile is cast to compute_dtype *inside* the kernel (cheap VPU work hidden under
    the tile DMA), so HBM only ever sees x in its caller-provided dtype — no separate
    wrapper cast/pad pass.  compute_dtype=f32 matches torch's x.float() exactly.
    """

    def kernel(x_ref, *refs):
        w_refs = refs[:num_weights]
        o_ref = refs[num_weights]
        h = x_ref[...].astype(compute_dtype)
        for idx, w_ref in enumerate(w_refs):
            h = jnp.dot(h, w_ref[...], preferred_element_type=jnp.float32)
            if idx + 1 < num_weights and compute_dtype != jnp.float32:
                h = h.astype(compute_dtype)   # feed next MXU pass in compute dtype
        o_ref[...] = h.astype(o_ref.dtype)

    return kernel


@functools.partial(jax.jit, static_argnames=("compute_dtype", "batch_tile"))
def _linear_chain_forward(x, weights, *, compute_dtype, batch_tile):
    """x: (B, D_in); weights: tuple of (in, out) matrices already in compute dtype."""
    B, D_in = x.shape
    D_out = weights[-1].shape[1]
    num_w = len(weights)

    # ---- batch-tile selection against a VMEM budget (all shapes static at trace) ----
    f32_size = jnp.dtype(jnp.float32).itemsize
    x_row = D_in * x.dtype.itemsize
    out_row = D_out * f32_size
    mid_row = (max(w.shape[1] for w in weights[:-1]) * f32_size) if num_w > 1 else 0
    w_bytes = sum(w.size * w.dtype.itemsize for w in weights)

    per_row = 2 * (x_row + out_row) + 2 * mid_row        # double-buffered tiles + chain temps
    tile_budget = (32 << 20) - 2 * w_bytes               # weights stay VMEM-resident
    tb_cap = max(8, (tile_budget // max(per_row, 1)) // 8 * 8)
    TB = max(8, min(batch_tile, tb_cap, _round_up(B, 8)) // 8 * 8)

    need = TB * per_row + 2 * w_bytes + (8 << 20)         # + headroom
    vmem_limit = int(min(56 << 20, max(32 << 20, need)))  # v7x: 64 MiB/TC physical cap

    grid = (pl.cdiv(B, TB),)  # ragged last tile: Pallas drops the out-of-bounds stores

    # Full-extent feature dims everywhere (legal even when < 8/128): no wrapper padding,
    # no post-kernel slice, no extra HBM passes.
    in_specs = [pl.BlockSpec((TB, D_in), lambda i: (i, 0))]
    for w in weights:
        # Constant index map -> each weight is fetched once and stays VMEM-resident.
        # TODO(synk): for non-toy D_hidden in the unfolded path, single-buffer these
        # resident weights (pl.Buffered(1)) or K/N-tile the chain; the folded path is
        # the intended fast path.
        in_specs.append(pl.BlockSpec(w.shape, lambda i: (0, 0)))
    out_specs = pl.BlockSpec((TB, D_out), lambda i: (i, 0))

    flops = sum(2 * B * w.shape[0] * w.shape[1] for w in weights)
    bytes_accessed = (
        x.size * x.dtype.itemsize
        + w_bytes
        + B * D_out * f32_size
    )

    return pl.pallas_call(
        _make_chain_kernel(num_w, compute_dtype),
        out_shape=jax.ShapeDtypeStruct((B, D_out), jnp.float32),
        grid=grid,
        in_specs=in_specs,
        out_specs=out_specs,
        compiler_params=pltpu.CompilerParams(
            dimension_semantics=("parallel",),   # megacore / 2-TC sharding on v7x
            vmem_limit_bytes=vmem_limit,
        ),
        cost_estimate=pl.CostEstimate(
            flops=flops, transcendentals=0, bytes_accessed=bytes_accessed
        ),
    )(x, *weights)


class LinearNetworkPallas:
    """JAX/Pallas port of Linear_Network (bias-free deep linear net, N in [2, 4])."""

    def __init__(self, D_in, D_hidden, D_out, N=2, *, key, std=1.0,
                 compute_dtype=jnp.bfloat16, fold_weights=True, batch_tile=None):
        assert D_hidden >= min(D_in, D_out)
        assert 2 <= N <= 4
        self.N = N
        self.D_in, self.D_hidden, self.D_out = D_in, D_hidden, D_out
        self.compute_dtype = jnp.dtype(compute_dtype)
        self.fold_weights = fold_weights
        self.batch_tile = int(batch_tile) if batch_tile is not None else _default_batch_tile()

        # normal_random_init(std) equivalent; stored as (in, out) = torch weight.T, f32 master.
        dims = [D_in] + [D_hidden] * (N - 1) + [D_out]
        keys = jax.random.split(key, N)
        self.weights = [
            jax.random.normal(keys[i], (dims[i], dims[i + 1]), dtype=jnp.float32) * std
            for i in range(N)
        ]
        self.refresh_kernel_weights()

    def refresh_kernel_weights(self):
        """(Re)build kernel-side weights.  Call after mutating self.weights."""
        if self.fold_weights:
            # Bias-free, activation-free chain == one matmul: fold once in f32.
            w_eff = self.weights[0]
            for w in self.weights[1:]:
                w_eff = jnp.dot(w_eff, w, preferred_element_type=jnp.float32)
            kernel_weights = [w_eff]
        else:
            kernel_weights = list(self.weights)
        self._kernel_weights = tuple(w.astype(self.compute_dtype) for w in kernel_weights)

    def update_weights(self, new_weights):
        assert len(new_weights) == self.N
        self.weights = [jnp.asarray(w, jnp.float32) for w in new_weights]
        self.refresh_kernel_weights()

    def __call__(self, x):
        lead = x.shape[:-1]
        if x.ndim != 2:                       # nn.Linear semantics for extra leading dims
            x = x.reshape(-1, x.shape[-1])
        out = _linear_chain_forward(
            x, self._kernel_weights,
            compute_dtype=self.compute_dtype, batch_tile=self.batch_tile,
        )
        if len(lead) != 1:
            out = out.reshape(*lead, self.D_out)
        return out


def _reference(x, weights):
    h = x.reshape(-1, x.shape[-1]).astype(jnp.float32)
    for w in weights:
        h = jnp.dot(h, w, preferred_element_type=jnp.float32)
    return h.reshape(*x.shape[:-1], weights[-1].shape[1])


if __name__ == "__main__":
    key = jax.random.PRNGKey(0)
    k_x, k_w, k_x2, k_x3 = jax.random.split(key, 4)

    B, D_in, D_hidden, D_out, N = 8, 32, 64, 16, 4
    std = 0.1
    x = jax.random.normal(k_x, (B, D_in), dtype=jnp.float32)

    # 1) Default path: folded single-matmul kernel, bf16 MXU inputs / f32 accumulation.
    model = LinearNetworkPallas(D_in, D_hidden, D_out, N=N, key=k_w, std=std)
    out = jax.block_until_ready(model(x))
    ref = _reference(x, model.weights)
    assert out.shape == (B, D_out)
    assert jnp.allclose(out, ref, rtol=3e-2, atol=3e-2), "bf16 folded kernel mismatch"

    # 2) f32 compute, multi-step grid with a ragged last batch tile (B=300, TB=128).
    model_f32 = LinearNetworkPallas(D_in, D_hidden, D_out, N=N, key=k_w, std=std,
                                    compute_dtype=jnp.float32, batch_tile=128)
    x_big = jax.random.normal(k_x2, (300, D_in), dtype=jnp.float32)
    out_big = jax.block_until_ready(model_f32(x_big))
    ref_big = _reference(x_big, model_f32.weights)
    assert out_big.shape == (300, D_out)
    assert jnp.allclose(out_big, ref_big, rtol=1e-3, atol=1e-3), "f32 folded mismatch"

    # Weights are real jit arguments (not static-self constants): updates take effect on
    # the next call with no retrace and no stale constants.
    model_f32.update_weights([w * 2.0 for w in model_f32.weights])
    out_big2 = jax.block_until_ready(model_f32(x_big))
    assert jnp.allclose(out_big2, ref_big * (2.0 ** N), rtol=1e-3, atol=1e-3), \
        "weight update not picked up"

    # 3) Unfolded per-layer chain, f32 compute, non-8-aligned tiny batch (B=5 < TB).
    model_chain = LinearNetworkPallas(D_in, D_hidden, D_out, N=N, key=k_w, std=std,
                                      compute_dtype=jnp.float32, fold_weights=False)
    x_small = jax.random.normal(k_x3, (5, D_in), dtype=jnp.float32)
    out_small = jax.block_until_ready(model_chain(x_small))
    ref_small = _reference(x_small, model_chain.weights)
    assert out_small.shape == (5, D_out)
    assert jnp.allclose(out_small, ref_small, rtol=1e-3, atol=1e-3), "chain kernel mismatch"

    print("KERNEL_OK")
</pallas_src>

<mosaic_0001>
module attributes {stable_mosaic.version = 11 : i64} {
  func.func @kernel(%arg0: i32, %arg1: memref<8x32xf32, #tpu.memory_space<vmem>>, %arg2: memref<32x16xbf16, #tpu.memory_space<vmem>>, %arg3: memref<8x16xf32, #tpu.memory_space<vmem>>) attributes {dimension_semantics = [#tpu.dimension_semantics<parallel>], iteration_bounds = array<i64: 1>, scalar_prefetch = 0 : i64, scratch_operands = 0 : i64, tpu.core_type = #tpu.core_type<tc>, window_params = [{transform_indices = @transform_0, window_bounds = array<i64: 8, 32>}, {pipeline_mode = #tpu.pipeline_mode<synchronous>, transform_indices = @transform_1, window_bounds = array<i64: 32, 16>}, {transform_indices = @transform_2, window_bounds = array<i64: 8, 16>}]} {
    %c0 = arith.constant 0 : index
    %c0_0 = arith.constant 0 : index
    %0 = vector.load %arg1[%c0, %c0_0] : memref<8x32xf32, #tpu.memory_space<vmem>>, vector<8x32xf32>
    %1 = arith.truncf %0 : vector<8x32xf32> to vector<8x32xbf16>
    %c0_1 = arith.constant 0 : index
    %c0_2 = arith.constant 0 : index
    %2 = vector.load %arg2[%c0_1, %c0_2] : memref<32x16xbf16, #tpu.memory_space<vmem>>, vector<32x16xbf16>
    %cst = arith.constant dense<0.000000e+00> : vector<8x16xf32>
    %3 = tpu.matmul %1, %2, %cst {dimension_numbers = #tpu.dot_dimension_numbers<[1], [0], [0], [1], [0, 0, 1, 1], [], []>} : vector<8x32xbf16>, vector<32x16xbf16>, vector<8x16xf32> -> vector<8x16xf32>
    %c0_3 = arith.constant 0 : index
    %c0_4 = arith.constant 0 : index
    %4 = vector.load %arg3[%c0_3, %c0_4] : memref<8x16xf32, #tpu.memory_space<vmem>>, vector<8x16xf32>
    tpu.vector_store %arg3[%c0_3, %c0_4], %3 {strides = array<i32>} : memref<8x16xf32, #tpu.memory_space<vmem>>, vector<8x16xf32>,
    return
  }
  func.func @transform_0(%arg0: i32) -> (i32, i32) {
    %c0_i32 = arith.constant 0 : i32
    %c0_i32_0 = arith.constant 0 : i32
    return %arg0, %c0_i32 : i32, i32
  }
  func.func @transform_1(%arg0: i32) -> (i32, i32) {
    %c0_i32 = arith.constant 0 : i32
    %c0_i32_0 = arith.constant 0 : i32
    %c0_i32_1 = arith.constant 0 : i32
    return %c0_i32, %c0_i32_0 : i32, i32
  }
  func.func @transform_2(%arg0: i32) -> (i32, i32) {
    %c0_i32 = arith.constant 0 : i32
    %c0_i32_0 = arith.constant 0 : i32
    return %arg0, %c0_i32 : i32, i32
  }
}

</mosaic_0001>

<bundles_post_ra>
// kernel: _linear_chain_forward.1
= control target key start
LH: loop header
LB: loop body
LE: loop exit
PB: predicated region body
PF: predicated region fallthrough
CT: control target
= control target key end

     0   :  { %v134_v1 = vmov 0.0   ;;  %vm135_vm0 = vmmov 0   ;;  %s173_s0 = inlined_call_operand.vmem [shape: f32[8,32], index: 0, kind: input, shape index: {}]   ;;  %s174_s1 = inlined_call_operand.vmem [shape: bf16[32,16], index: 1, kind: input, shape index: {}]   ;;  %s175_s2 = inlined_call_operand.hbm [shape: f32[8,16], index: 2, kind: output, shape index: {}]  }
   0x1   :  { %v108_v0 = vld [vmem:[%s174_s1] sm:$0xff]   ;;  %97 = vmatprep.subr.bf16.mxu0 %v134_v1  ;;  %v109_v2 = vld [vmem:[%s174_s1 + $0x8] sm:$0xff]   ;;  %101 = vmatprep.mubr.msk.bf16.mxu0 %vm135_vm0, %v134_v1 }
   0x2   :  { %98 = vmatpush3.bf16.msra.mxu0 %v108_v0  ;;  %v13_v3 = vld [vmem:[%s173_s0] sm:$0xff] }
   0x3   :  { %7 = vsyncpa [#allocation3], 0  ;;  %99 = vmatprep.subr.bf16.mxu0 %v134_v1  ;;  %v14_v4 = vpack.c.bf16 %v13_v3, %v13_v3  ;;  %vm31_vm1 = vcmask 261120   ;;  %s136_s15 = smov [#allocation2]   ;;  %vm75_vm2 = vcmask 130048  }
   0x4   :  { %s83_s16 = sshll.u32 %s136_s15, 4  ;;  %s84_s16 = int_to_ptr.vmem [resolvable:$true] %s83_s16 }
   0x5   :  { %s110_s1 = scalar_lea.vmem %s84_s16, 128  ;;  %p115_p1 = scmp.lt.s32.totalorder %s84_s16, %s84_s16 }
   0x6   :  { %100 = vmatpush3.bf16.msra.mxu0 %v109_v2  ;;  %p111_p0 = scmp.ne.s32.totalorder %s84_s16, %s110_s1  ;;  %p116_p2 = scmp.lt.s32.totalorder %s110_s1, %s110_s1 }
   0x8   :  { %p117_p3 = por %p116_p2, %p115_p1 }
   0x9   :  { %102 = vmatmul.mubr.msk.bf16.vlgmr.msra.gmra.mrb[0].mxu0 %vm31_vm1, %v14_v4 }
   0xa   :  { %p118_p4 = pnand %p117_p3, %p111_p0 }
  0xdc   :  { %v69_v5 = vpop.f32.mrb[0].mxu0 }
  0xdd   :  { %76 = vst.msk [vmem:[#allocation2] sm:$0xff] %vm75_vm2, %v69_v5  ;;  %v103_v6 = vpop.f32.mrb[1].mxu0 }
  0xde   :  { %v72_v7 = vpop.f32.mrb[2].mxu0 }
  0xdf   :  { %121 = shalt.err (!%p118_p4)
}
  0xe0   :  { %s122_s18 = scalar_lea.hbm %s175_s2, 128 }
  0xe1   :  { %p123_p5 = scmp.ne.s32.totalorder %s175_s2, %s122_s18  ;;  %p126_p6 = scmp.lt.u32.totalorder %s122_s18, %s175_s2 }
  0xe3   :  { %p128_p7 = pnand %p126_p6, %p123_p5 }
  0xe5   :  { %131 = shalt.err (!%p128_p7)
}
  0xe6   :  { %86 = dma.vmem_to_hbm [thread:$0]  %s84_s16, 128, %s175_s2, [#allocation3]   ;;  %v104_v8 = vpop.f32.mrb[3].mxu0 }
  0xe7   :  { %132 = dma.done.wait [#allocation3], 128  }
  0xe8   :  { %133 = vsyncadd [#allocation3], 4294967168 }
  0xe9   :  { %90 = vsyncpa [#allocation3], 1 }

</bundles_post_ra>
